<compile_context>
chip_gen: v7x
topology: tpu7x:2x2x1
jax: 0.10.0
libtpu: 0.0.40
codegen_flags: <defaults>
</compile_context>

<pallas_src>
import jax
import jax.numpy as jnp
from jax.experimental import pallas as pl
from jax.experimental.pallas import tpu as pltpu


def _round_up(a, b):
    return ((a + b - 1) // b) * b


def _make_kernel(d):
    def kernel(inv_len_ref, x_ref, y_ref, o_ref):
        # inv_len_ref : (1,)    f32 SMEM (scalar prefetch) -> 1 / ||y[0]||
        # x_ref,y_ref : (d, TN) f32 VMEM tiles (vertices on lanes)
        # o_ref       : (1, TN) f32 VMEM tile  (lane-dense output)
        acc = x_ref[0:1, :] * y_ref[0:1, :]
        for k in range(1, d):  # static unroll (d == 3): stays on (1, TN) VPU adds
            acc = acc + x_ref[k:k + 1, :] * y_ref[k:k + 1, :]
        o_ref[...] = acc * inv_len_ref[0]

    return kernel


def geometrical_pen_dn(x_dn, y_dn, *, tn_max=65536, tn_floor=8192, target_steps=4):
    """Preferred zero-copy path: normals provided in (D, N) layout.

    Returns an (N,) float32 array; element i == dot(x[:, i], y[:, i]) / ||y[:, 0]||.
    """
    x = jnp.asarray(x_dn, jnp.float32)
    y = jnp.asarray(y_dn, jnp.float32)
    d, n = x.shape
    assert y.shape == (d, n)

    # Normalization scalar, computed once (d elements) in the wrapper.
    inv_len = (1.0 / jnp.sqrt(jnp.sum(y[:, 0] * y[:, 0]))).reshape((1,))

    # Lane-aligned tile: >= target_steps grid steps for large N, floored so per-step
    # overhead stays amortized, capped for VMEM, never larger than the (aligned) array.
    n_lane = _round_up(n, 128)
    tn = max(
        128,
        min(
            tn_max,
            n_lane,
            max(tn_floor, _round_up(pl.cdiv(n, target_steps), 128)),
        ),
    )
    grid = (pl.cdiv(n, tn),)  # no padding: Pallas masks the partial last block

    out = pl.pallas_call(
        _make_kernel(d),
        out_shape=jax.ShapeDtypeStruct((1, n), jnp.float32),
        grid_spec=pltpu.PrefetchScalarGridSpec(
            num_scalar_prefetch=1,  # inv_len -> SMEM, visible to every tile
            grid=grid,
            in_specs=[
                pl.BlockSpec((d, tn), lambda i, inv: (0, i)),
                pl.BlockSpec((d, tn), lambda i, inv: (0, i)),
            ],
            out_specs=pl.BlockSpec((1, tn), lambda i, inv: (0, i)),
        ),
        compiler_params=pltpu.CompilerParams(
            dimension_semantics=("parallel",),      # shard vertex tiles across TCs (v7x)
            vmem_limit_bytes=32 * 1024 * 1024,      # > v5e's 16 MiB scoped default
        ),
    )(inv_len, x, y)

    return out[0, :]


def geometrical_pen(x_normals, y_normals, **kwargs):
    """PyTorch-layout wrapper: (N, D) inputs, matching Geometrical_Pen.forward.

    NOTE: the transpose below is a materialized HBM copy; producers that can emit
    (D, N) directly should call `geometrical_pen_dn` instead (zero extra HBM passes).
    """
    x = jnp.asarray(x_normals, jnp.float32)
    y = jnp.asarray(y_normals, jnp.float32)
    n, d = x.shape
    assert y.shape == (n, d)
    return geometrical_pen_dn(x.T, y.T, **kwargs)


def _reference(x_normals, y_normals):
    y_len = jnp.sqrt(jnp.sum(y_normals[0, :] ** 2))
    return jnp.sum(x_normals * (y_normals / y_len), axis=-1)


if __name__ == "__main__":
    key = jax.random.PRNGKey(0)
    kx, ky, kx2, ky2, kx3, ky3 = jax.random.split(key, 6)

    # 1) Module-consistent shapes (8 vertices, 3-D normals), PyTorch (N, D) layout.
    num_vertices, dim = 8, 3
    x_normals = jax.random.normal(kx, (num_vertices, dim), dtype=jnp.float32)
    y_normals = jax.random.normal(ky, (num_vertices, dim), dtype=jnp.float32)
    n_pen = jax.block_until_ready(geometrical_pen(x_normals, y_normals))
    ref = _reference(x_normals, y_normals)
    assert n_pen.shape == (num_vertices,)
    assert jnp.allclose(n_pen, ref, rtol=1e-5, atol=1e-5), (n_pen, ref)

    # 2) Preferred zero-copy (D, N) entry point on the same data.
    n_pen_dn = jax.block_until_ready(geometrical_pen_dn(x_normals.T, y_normals.T))
    assert jnp.allclose(n_pen_dn, ref, rtol=1e-5, atol=1e-5)

    # 3) Multi-step pipelined path with a partial last block (no padding), small tiles.
    n2, d2 = 300, 3
    x2 = jax.random.normal(kx2, (n2, d2), dtype=jnp.float32)
    y2 = jax.random.normal(ky2, (n2, d2), dtype=jnp.float32)
    n_pen2 = jax.block_until_ready(geometrical_pen(x2, y2, tn_max=128))
    ref2 = _reference(x2, y2)
    assert n_pen2.shape == (n2,)
    assert jnp.allclose(n_pen2, ref2, rtol=1e-5, atol=1e-5)

    # 4) Larger N exercising the default tile-sizing heuristic (grid > 1, partial tail).
    n3, d3 = 20000, 3
    x3 = jax.random.normal(kx3, (d3, n3), dtype=jnp.float32)   # already (D, N)
    y3 = jax.random.normal(ky3, (d3, n3), dtype=jnp.float32)
    n_pen3 = jax.block_until_ready(geometrical_pen_dn(x3, y3))
    ref3 = _reference(x3.T, y3.T)
    assert n_pen3.shape == (n3,)
    assert jnp.allclose(n_pen3, ref3, rtol=1e-5, atol=1e-5)

    print("KERNEL_OK")
</pallas_src>

<mosaic_0001>
module attributes {stable_mosaic.version = 11 : i64} {
  func.func @kernel(%arg0: i32, %arg1: memref<1xf32, #tpu.memory_space<smem>>, %arg2: memref<3x128xf32, #tpu.memory_space<vmem>>, %arg3: memref<3x128xf32, #tpu.memory_space<vmem>>, %arg4: memref<1x128xf32, #tpu.memory_space<vmem>>) attributes {dimension_semantics = [#tpu.dimension_semantics<parallel>], iteration_bounds = array<i64: 1>, scalar_prefetch = 1 : i64, scratch_operands = 0 : i64, tpu.core_type = #tpu.core_type<tc>, window_params = [{transform_indices = @transform_0, window_bounds = array<i64: 3, 128>}, {transform_indices = @transform_1, window_bounds = array<i64: 3, 128>}, {transform_indices = @transform_2, window_bounds = array<i64: 1, 128>}]} {
    %c0 = arith.constant 0 : index
    %c0_0 = arith.constant 0 : index
    %0 = vector.load %arg2[%c0, %c0_0] : memref<3x128xf32, #tpu.memory_space<vmem>>, vector<1x128xf32>
    %c0_1 = arith.constant 0 : index
    %c0_2 = arith.constant 0 : index
    %1 = vector.load %arg3[%c0_1, %c0_2] : memref<3x128xf32, #tpu.memory_space<vmem>>, vector<1x128xf32>
    %2 = arith.mulf %0, %1 : vector<1x128xf32>
    %c1 = arith.constant 1 : index
    %c0_3 = arith.constant 0 : index
    %3 = vector.load %arg2[%c1, %c0_3] : memref<3x128xf32, #tpu.memory_space<vmem>>, vector<1x128xf32>
    %c1_4 = arith.constant 1 : index
    %c0_5 = arith.constant 0 : index
    %4 = vector.load %arg3[%c1_4, %c0_5] : memref<3x128xf32, #tpu.memory_space<vmem>>, vector<1x128xf32>
    %5 = arith.mulf %3, %4 : vector<1x128xf32>
    %6 = arith.addf %2, %5 : vector<1x128xf32>
    %c2 = arith.constant 2 : index
    %c0_6 = arith.constant 0 : index
    %7 = vector.load %arg2[%c2, %c0_6] : memref<3x128xf32, #tpu.memory_space<vmem>>, vector<1x128xf32>
    %c2_7 = arith.constant 2 : index
    %c0_8 = arith.constant 0 : index
    %8 = vector.load %arg3[%c2_7, %c0_8] : memref<3x128xf32, #tpu.memory_space<vmem>>, vector<1x128xf32>
    %9 = arith.mulf %7, %8 : vector<1x128xf32>
    %10 = arith.addf %6, %9 : vector<1x128xf32>
    %c0_9 = arith.constant 0 : index
    %11 = memref.load %arg1[%c0_9] : memref<1xf32, #tpu.memory_space<smem>>
    %12 = vector.broadcast %11 : f32 to vector<1x128xf32>
    %13 = arith.mulf %10, %12 : vector<1x128xf32>
    %c0_10 = arith.constant 0 : index
    %c0_11 = arith.constant 0 : index
    %14 = vector.load %arg4[%c0_10, %c0_11] : memref<1x128xf32, #tpu.memory_space<vmem>>, vector<1x128xf32>
    tpu.vector_store %arg4[%c0_10, %c0_11], %13 {strides = array<i32>} : memref<1x128xf32, #tpu.memory_space<vmem>>, vector<1x128xf32>,
    return
  }
  func.func @transform_0(%arg0: i32, %arg1: memref<1xf32, #tpu.memory_space<smem>>) -> (i32, i32) {
    %c0_i32 = arith.constant 0 : i32
    %c0_i32_0 = arith.constant 0 : i32
    return %c0_i32, %arg0 : i32, i32
  }
  func.func @transform_1(%arg0: i32, %arg1: memref<1xf32, #tpu.memory_space<smem>>) -> (i32, i32) {
    %c0_i32 = arith.constant 0 : i32
    %c0_i32_0 = arith.constant 0 : i32
    return %c0_i32, %arg0 : i32, i32
  }
  func.func @transform_2(%arg0: i32, %arg1: memref<1xf32, #tpu.memory_space<smem>>) -> (i32, i32) {
    %c0_i32 = arith.constant 0 : i32
    %c0_i32_0 = arith.constant 0 : i32
    return %c0_i32, %arg0 : i32, i32
  }
}

</mosaic_0001>

<bundles_post_ra>
// kernel: tpu_custom_call.1
= control target key start
LH: loop header
LB: loop body
LE: loop exit
PB: predicated region body
PF: predicated region fallthrough
CT: control target
= control target key end

     0   :  { %9 = vsyncpa [#allocation5], 0  ;;  %s164_s0 = inlined_call_operand.<no memory space> [shape: f32[1], index: 0, kind: input, shape index: {}]   ;;  %s165_s1 = inlined_call_operand.hbm [shape: f32[3,8], index: 1, kind: input, shape index: {}]   ;;  %s166_s2 = inlined_call_operand.vmem [shape: f32[3,8], index: 2, kind: input, shape index: {}]   ;;  %s167_s3 = inlined_call_operand.hbm [shape: f32[1,8], index: 3, kind: output, shape index: {}]  }
   0x1   :  { %10 = vsyncpa [#allocation6], 0  ;;  %s106_s12 = smov [#allocation4]   ;;  %s58_s16 = scalar_lea.hbm %s165_s1, 64 }
   0x2   :  { %s17_s13 = sshll.u32 %s106_s12, 4  ;;  %p59_p0 = scmp.ne.s32.totalorder %s165_s1, %s58_s16  ;;  %s18_s13 = int_to_ptr.vmem [resolvable:$true] %s17_s13 }
   0x3   :  { %p62_p1 = scmp.lt.u32.totalorder %s58_s16, %s165_s1 }
   0x5   :  { %p64_p2 = pnand %p62_p1, %p59_p0 }
   0x7   :  { %67 = shalt.err (!%p64_p2)
}
   0x8   :  { %s68_s21 = scalar_lea.vmem %s18_s13, 64  ;;  %p73_p4 = scmp.lt.s32.totalorder %s18_s13, %s18_s13 }
   0x9   :  { %p69_p3 = scmp.ne.s32.totalorder %s18_s13, %s68_s21  ;;  %p74_p5 = scmp.lt.s32.totalorder %s68_s21, %s68_s21 }
   0xb   :  { %p75_p6 = por %p74_p5, %p73_p4 }
   0xd   :  { %p76_p7 = pnand %p75_p6, %p69_p3 }
   0xf   :  { %79 = shalt.err (!%p76_p7)
}
  0x10   :  { %20 = dma.hbm_to_vmem [thread:$0]  %s165_s1, 64, %s18_s13, [#allocation5]  }
  0x11   :  { %102 = dma.done.wait [#allocation5], 64  }
  0x12   :  { %103 = vsyncadd [#allocation5], 4294967232  ;;  %v26_v0 = vld [vmem:[#allocation4] sm:$0x1]  ;;  %v29_v2 = vld [vmem:[#allocation4 + $0x1] sm:$0x1]  ;;  %v38_v10 = vstv %s164_s0 }
  0x13   :  { %v27_v1 = vld [vmem:[%s166_s2] sm:$0x1]  ;;  %v30_v4 = vld [vmem:[%s166_s2 + $0x1] sm:$0x1]  ;;  %v33_v5 = vld [vmem:[#allocation4 + $0x2] sm:$0x1] }
  0x14   :  { %v28_v3 = vmul.f32 %v27_v1, %v26_v0  ;;  %v34_v6 = vld [vmem:[%s166_s2 + $0x2] sm:$0x1]  ;;  %v31_v7 = vmul.f32 %v30_v4, %v29_v2  ;;  %s107_s4 = smov [#allocation7]  }
  0x15   :  { %v35_v8 = vmul.f32 %v34_v6, %v33_v5  ;;  %s47_s5 = sshll.u32 %s107_s4, 4  ;;  %s48_s5 = int_to_ptr.vmem [resolvable:$true] %s47_s5 }
  0x16   :  { %v32_v9 = vadd.f32 %v31_v7, %v28_v3  ;;  %s80_s6 = scalar_lea.vmem %s48_s5, 16  ;;  %s84_s7 = scalar_lea.vmem %s48_s5, 32 }
  0x17   :  { %p81_p8 = scmp.ne.s32.totalorder %s48_s5, %s80_s6  ;;  %p85_p9 = scmp.lt.s32.totalorder %s48_s5, %s48_s5 }
  0x18   :  { %v36_v11 = vadd.f32 %v35_v8, %v32_v9  ;;  %p86_p10 = scmp.lt.s32.totalorder %s84_s7, %s80_s6 }
  0x1a   :  { %v39_v12 = vmul.f32 %v38_v10, %v36_v11  ;;  %p87_p11 = por %p86_p10, %p85_p9 }
  0x1c   :  { %40 = vst [vmem:[#allocation7] sm:$0x1] %v39_v12  ;;  %p88_p12 = pnand %p87_p11, %p81_p8 }
  0x1e   :  { %91 = shalt.err (!%p88_p12)
}
  0x1f   :  { %s92_s9 = scalar_lea.hbm %s167_s3, 16 }
  0x20   :  { %p93_p13 = scmp.ne.s32.totalorder %s167_s3, %s92_s9  ;;  %p96_p0 = scmp.lt.u32.totalorder %s92_s9, %s167_s3 }
  0x22   :  { %p98_p1 = pnand %p96_p0, %p93_p13 }
  0x24   :  { %101 = shalt.err (!%p98_p1)
}
  0x25   :  { %50 = dma.vmem_to_hbm [thread:$0]  %s48_s5, 16, %s167_s3, [#allocation6]  }
  0x26   :  { %104 = dma.done.wait [#allocation6], 16  }
  0x27   :  { %105 = vsyncadd [#allocation6], 4294967280 }
  0x28   :  { %54 = vsyncpa [#allocation5], 1 }
  0x29   :  { %55 = vsyncpa [#allocation6], 1 }

</bundles_post_ra>
